<compile_context>
chip_gen: v5e
topology: v5e:2x2
jax: 0.10.0
libtpu: 0.0.40
codegen_flags: <defaults>
</compile_context>

<pallas_src>
import jax
import jax.numpy as jnp
from jax.experimental import pallas as pl
from jax.experimental.pallas import tpu as pltpu

# ---------------- synthetic small config (mirrors the RNNT structure) -------
FEAT = 32          # preprocessed mel-feature dim
T_FRAMES = 8       # encoder frames per chunk
ENC = 64           # encoder output dim (d_model)
EMB = 64           # prediction-net embedding dim
HID = 128          # prediction-net LSTM hidden dim (PRED_RNN_LAYERS = 1)
JOINT = 64         # joint hidden dim
VOCAB = 16         # synthetic vocabulary size
NUM_CLASSES = VOCAB + 1        # vocab + blank
BLANK_INDEX = VOCAB            # blank == last class (mirrors STT.BLANK_INDEX)
SOS = VOCAB                    # mirrors STT.SOS == BLANK_INDEX
MAX_SYMBOLS = 10
PRED_RNN_LAYERS = 1
PADC = 128                     # logits padded to a full 128-lane row

assert T_FRAMES * MAX_SYMBOLS <= PADC, "token buffer must fit in one lane row"

# TODO(synk): the real FastConformer streaming encoder (conv subsampling, MHSA,
# cache_last_channel / cache_last_time state) has no clean small Pallas
# equivalent; a single projection + tanh stands in for it here.


# ------------------------------ fused Pallas kernel --------------------------
def _stt_decode_kernel(scalars_ref,                      # SMEM (2,): [last_token, enc_len]
                       x_ref, enc_w_ref, enc_b_ref,      # encoder stand-in
                       j_we_ref, j_fb_ref,               # enc-side joint proj (+folded biases)
                       emb_wih_ref, whh_ref, b_lstm_ref, # prediction net (embed folded)
                       j_wp_ref,                         # pred-side joint projection
                       j_wo_ref, j_bo_ref,               # padded joint output proj
                       hc0_ref,                          # (2, HID) initial decoder state
                       tok_ref, hc_ref,                  # outputs (written once at the end)
                       f_scratch):                       # VMEM (T_FRAMES, JOINT)
    last_token0 = scalars_ref[0]
    enc_len = jnp.minimum(scalars_ref[1], T_FRAMES)

    # Simplified encoder + encoder-side joint projection, hoisted out of the
    # per-frame / per-symbol loops.  j_be and j_bp are pre-folded into j_fb so
    # the symbol loop has no joint bias adds:
    #   f[t] = tanh(x @ We + be) @ Wje + (bje + bjp)
    enc = jnp.tanh(
        jnp.dot(x_ref[...], enc_w_ref[...],
                preferred_element_type=jnp.float32) + enc_b_ref[...])
    f_scratch[...] = (
        jnp.dot(enc, j_we_ref[...], preferred_element_type=jnp.float32)
        + j_fb_ref[...])

    lane = jax.lax.broadcasted_iota(jnp.int32, (1, PADC), 1)

    def frame_body(t, frame_carry):
        h0, c0, toks0, last0, count0 = frame_carry
        f_t = f_scratch[pl.ds(t, 1), :]                              # (1, JOINT)

        def cond_fn(carry):
            _, _, _, _, _, symbols, not_blank = carry
            return jnp.logical_and(not_blank, symbols < MAX_SYMBOLS)

        def body_fn(carry):
            h, c, toks, last_tok, count, symbols, _ = carry

            # prediction net (1-layer LSTM).  The embedding is pre-folded into
            # the input projection (emb_wih = E @ Wih); last_tok < 0 (SOS/None)
            # selects the appended all-zero row -> zero input contribution.
            row = jnp.where(last_tok < 0, jnp.int32(NUM_CLASSES), last_tok)
            x_proj = emb_wih_ref[row]                                # (1, 4*HID)
            gates = (x_proj
                     + jnp.dot(h, whh_ref[...],
                               preferred_element_type=jnp.float32)
                     + b_lstm_ref[...])                              # (1, 4*HID)
            # gates are host-side reordered to (i, f, o, g): one fused sigmoid
            sig = jax.nn.sigmoid(gates[:, 0:3 * HID])
            i_g = sig[:, 0 * HID:1 * HID]
            f_g = sig[:, 1 * HID:2 * HID]
            o_g = sig[:, 2 * HID:3 * HID]
            g_g = jnp.tanh(gates[:, 3 * HID:4 * HID])
            c_new = f_g * c + i_g * g_g
            h_new = o_g * jnp.tanh(c_new)

            # joint: relu(f_enc(t) + Wp @ pred) -> padded logits (1, 128)
            g_pred = jnp.dot(h_new, j_wp_ref[...],
                             preferred_element_type=jnp.float32)
            hj = jnp.maximum(f_t + g_pred, 0.0)
            logits = (jnp.dot(hj, j_wo_ref[...],
                              preferred_element_type=jnp.float32)
                      + j_bo_ref[...])

            # exact first-max argmax; pad lanes carry -1e30 bias so they lose
            m = jnp.max(logits, axis=-1, keepdims=True)
            k = jnp.min(jnp.where(logits == m, lane, PADC)).astype(jnp.int32)
            not_blank = k != BLANK_INDEX

            # commit state / emit token only on non-blank predictions
            emit = jnp.logical_and(not_blank, lane == count)
            toks = jnp.where(emit, k, toks)
            h = jnp.where(not_blank, h_new, h)
            c = jnp.where(not_blank, c_new, c)
            last_tok = jnp.where(not_blank, k, last_tok)
            count = count + not_blank.astype(jnp.int32)
            return (h, c, toks, last_tok, count, symbols + 1, not_blank)

        out = jax.lax.while_loop(
            cond_fn, body_fn,
            (h0, c0, toks0, last0, count0,
             jnp.array(0, jnp.int32), jnp.array(True)))
        return out[:5]

    h, c, toks, _, _ = jax.lax.fori_loop(
        0, enc_len, frame_body,
        (hc0_ref[0:1, :], hc0_ref[1:2, :],
         jnp.full((1, PADC), -1, jnp.int32),
         last_token0, jnp.array(0, jnp.int32)))

    # single write-back of all persistent state
    tok_ref[...] = toks
    hc_ref[0:1, :] = h
    hc_ref[1:2, :] = c


# ------------------------------ jitted wrapper --------------------------------
def _resident(shape):
    """Full-array block with a constant index map -> fetched once, VMEM-resident."""
    nd = len(shape)
    return pl.BlockSpec(shape, lambda i, s, _nd=nd: (0,) * _nd)


@jax.jit
def _stt_forward_fused(processed_signal, processed_signal_length,
                       kernel_weights, hc0, last_token):
    (enc_w, enc_b, j_we, j_fb, emb_wih, whh, b_lstm,
     j_wp, j_wo_pad, j_bo_pad) = kernel_weights

    # (B, FEAT, T) -> batch 0, (T, FEAT)
    x_tf = jnp.transpose(processed_signal[0], (1, 0)).astype(jnp.float32)
    scalars = jnp.stack([jnp.asarray(last_token, jnp.int32),
                         processed_signal_length[0].astype(jnp.int32)])

    grid_spec = pltpu.PrefetchScalarGridSpec(
        num_scalar_prefetch=1,
        grid=(1,),
        in_specs=[
            _resident((T_FRAMES, FEAT)),
            _resident((FEAT, ENC)), _resident((1, ENC)),
            _resident((ENC, JOINT)), _resident((1, JOINT)),
            _resident((NUM_CLASSES + 1, 1, 4 * HID)),
            _resident((HID, 4 * HID)), _resident((1, 4 * HID)),
            _resident((HID, JOINT)),
            _resident((JOINT, PADC)), _resident((1, PADC)),
            _resident((2, HID)),
        ],
        out_specs=[_resident((1, PADC)), _resident((2, HID))],
        scratch_shapes=[
            pltpu.VMEM((T_FRAMES, JOINT), jnp.float32),   # hoisted enc-side joint proj
        ],
    )

    tok_pad, hc_new = pl.pallas_call(
        _stt_decode_kernel,
        grid_spec=grid_spec,
        out_shape=(jax.ShapeDtypeStruct((1, PADC), jnp.int32),
                   jax.ShapeDtypeStruct((2, HID), jnp.float32)),
        compiler_params=pltpu.CompilerParams(
            dimension_semantics=("arbitrary",)),
    )(scalars, x_tf, enc_w, enc_b, j_we, j_fb, emb_wih, whh, b_lstm,
      j_wp, j_wo_pad, j_bo_pad, hc0)
    return tok_pad, hc_new


# ------------------------------ parameter init --------------------------------
def init_params(key):
    ks = jax.random.split(key, 12)
    scale = 0.1
    return {
        # simplified encoder
        "enc_w": scale * jax.random.normal(ks[0], (FEAT, ENC), jnp.float32),
        "enc_b": scale * jax.random.normal(ks[1], (1, ENC), jnp.float32),
        # prediction net: embedding + 1-layer LSTM (combined bias b_ih + b_hh)
        "embed": scale * jax.random.normal(ks[2], (NUM_CLASSES, EMB), jnp.float32),
        "wih": scale * jax.random.normal(ks[3], (EMB, 4 * HID), jnp.float32),
        "whh": scale * jax.random.normal(ks[4], (HID, 4 * HID), jnp.float32),
        "b_lstm": scale * jax.random.normal(ks[5], (1, 4 * HID), jnp.float32),
        # joint net
        "j_we": scale * jax.random.normal(ks[6], (ENC, JOINT), jnp.float32),
        "j_be": scale * jax.random.normal(ks[7], (1, JOINT), jnp.float32),
        "j_wp": scale * jax.random.normal(ks[8], (HID, JOINT), jnp.float32),
        "j_bp": scale * jax.random.normal(ks[9], (1, JOINT), jnp.float32),
        "j_wo": scale * jax.random.normal(ks[10], (JOINT, NUM_CLASSES), jnp.float32),
        "j_bo": scale * jax.random.normal(ks[11], (1, NUM_CLASSES), jnp.float32),
    }


def _reorder_ifgo_to_ifog(w):
    """Permute the 4*HID gate columns from PyTorch (i,f,g,o) to (i,f,o,g) so
    the kernel can issue a single fused sigmoid over the first 3*HID lanes."""
    i, f, g, o = jnp.split(w, 4, axis=-1)
    return jnp.concatenate([i, f, o, g], axis=-1)


def prepare_kernel_weights(p):
    """Fold the embedding into the LSTM input projection (plus an all-zero SOS
    row for dynamic row lookup), reorder the LSTM gate columns, fold the joint
    biases (j_be + j_bp) into the hoisted encoder-side projection, and pad the
    joint output projection to a lane-dense 128-class layout (pad bias = -1e30
    so padded classes can never win the in-kernel argmax)."""
    emb_wih = jnp.concatenate(
        [jnp.dot(p["embed"], p["wih"]),
         jnp.zeros((1, 4 * HID), jnp.float32)], axis=0)               # (18, 4*HID)
    emb_wih = _reorder_ifgo_to_ifog(emb_wih)[:, None, :]              # (18, 1, 4*HID)
    whh = _reorder_ifgo_to_ifog(p["whh"])
    b_lstm = _reorder_ifgo_to_ifog(p["b_lstm"])
    j_fb = p["j_be"] + p["j_bp"]                                       # folded joint biases
    j_wo_pad = jnp.zeros((JOINT, PADC), jnp.float32).at[:, :NUM_CLASSES].set(p["j_wo"])
    j_bo_pad = jnp.full((1, PADC), -1e30, jnp.float32).at[:, :NUM_CLASSES].set(p["j_bo"])
    return (p["enc_w"], p["enc_b"], p["j_we"], j_fb,
            emb_wih, whh, b_lstm,
            p["j_wp"], j_wo_pad, j_bo_pad)


# ------------------------------ streaming STT wrapper --------------------------
class STTPallas:
    """Mirrors STT.forward streaming semantics: accumulates y_sequence and
    carries (dec_state, last_token) across chunks. last_token == -1 <=> None/SOS
    and dec_state == zeros <=> None (identical LSTM behaviour)."""

    def __init__(self, params):
        self.params = params
        self.kernel_weights = prepare_kernel_weights(params)
        self.y_sequence = []
        self.hc = jnp.zeros((2, HID), jnp.float32)   # (h; c) of the 1-layer LSTM
        self.last_token = -1

    def forward(self, processed_signal, processed_signal_length):
        tok_pad, hc_new = _stt_forward_fused(
            processed_signal, processed_signal_length,
            self.kernel_weights, self.hc, jnp.int32(self.last_token))
        toks = [int(v) for v in tok_pad[0].tolist() if v >= 0]
        self.y_sequence.extend(toks)
        if toks:                                     # state commits only on non-blank
            self.last_token = toks[-1]
        self.hc = hc_new                             # unchanged by kernel if no emission
        return self.y_sequence


# ------------------------------ pure-JAX reference -----------------------------
def reference_forward(params, processed_signal, processed_signal_length,
                      y_sequence, hc, last_token):
    x = jnp.transpose(processed_signal[0], (1, 0))
    enc = jnp.tanh(x @ params["enc_w"] + params["enc_b"])
    h, c = hc[0:1, :], hc[1:2, :]
    y = list(y_sequence)
    lt = last_token
    enc_len = int(processed_signal_length[0])
    for t_i in range(enc_len):
        enc_t = enc[t_i:t_i + 1, :]
        not_blank, sym = True, 0
        while not_blank and sym < MAX_SYMBOLS:
            if lt < 0:
                emb = jnp.zeros((1, EMB), jnp.float32)
            else:
                emb = params["embed"][lt][None, :]
            gates = emb @ params["wih"] + h @ params["whh"] + params["b_lstm"]
            i_g = jax.nn.sigmoid(gates[:, 0 * HID:1 * HID])
            f_g = jax.nn.sigmoid(gates[:, 1 * HID:2 * HID])
            g_g = jnp.tanh(gates[:, 2 * HID:3 * HID])
            o_g = jax.nn.sigmoid(gates[:, 3 * HID:4 * HID])
            c_new = f_g * c + i_g * g_g
            h_new = o_g * jnp.tanh(c_new)
            fj = enc_t @ params["j_we"] + params["j_be"]
            gj = h_new @ params["j_wp"] + params["j_bp"]
            logits = jnp.maximum(fj + gj, 0.0) @ params["j_wo"] + params["j_bo"]
            k = int(jnp.argmax(logits[0]))
            if k == BLANK_INDEX:
                not_blank = False
            else:
                y.append(k)
                h, c = h_new, c_new
                lt = k
            sym += 1
    return y, jnp.concatenate([h, c], axis=0), lt


# ------------------------------------ main --------------------------------------
if __name__ == "__main__":
    key = jax.random.PRNGKey(0)
    k_sig1, k_sig2, k_par = jax.random.split(key, 3)

    params = init_params(k_par)
    chunk1 = jax.random.normal(k_sig1, (1, FEAT, T_FRAMES), jnp.float32)  # (B, FEAT, T)
    chunk2 = jax.random.normal(k_sig2, (1, FEAT, T_FRAMES), jnp.float32)
    lengths = jnp.array([T_FRAMES], jnp.int32)

    # Pallas streaming decode over two chunks (exercises state carry-over).
    stt = STTPallas(params)
    y1 = list(stt.forward(chunk1, lengths))
    y2 = list(stt.forward(chunk2, lengths))
    jax.block_until_ready(stt.hc)

    # pure-JAX reference of the same greedy RNNT decode
    ref_y, ref_hc, ref_last = [], jnp.zeros((2, HID), jnp.float32), -1
    for ch in (chunk1, chunk2):
        ref_y, ref_hc, ref_last = reference_forward(
            params, ch, lengths, ref_y, ref_hc, ref_last)

    assert y2 == ref_y, (y2, ref_y)
    assert stt.last_token == ref_last, (stt.last_token, ref_last)
    assert bool(jnp.allclose(stt.hc, ref_hc, atol=1e-3, rtol=1e-3))
    assert all(0 <= tok < NUM_CLASSES and tok != BLANK_INDEX for tok in y2)
    print("KERNEL_OK")
</pallas_src>

<mosaic_0001>
module attributes {stable_mosaic.version = 11 : i64} {
  func.func @_stt_decode_kernel(%arg0: i32, %arg1: memref<2xi32, #tpu.memory_space<smem>>, %arg2: memref<8x32xf32, #tpu.memory_space<vmem>>, %arg3: memref<32x64xf32, #tpu.memory_space<vmem>>, %arg4: memref<1x64xf32, #tpu.memory_space<vmem>>, %arg5: memref<64x64xf32, #tpu.memory_space<vmem>>, %arg6: memref<1x64xf32, #tpu.memory_space<vmem>>, %arg7: memref<18x1x512xf32, #tpu.memory_space<vmem>>, %arg8: memref<128x512xf32, #tpu.memory_space<vmem>>, %arg9: memref<1x512xf32, #tpu.memory_space<vmem>>, %arg10: memref<128x64xf32, #tpu.memory_space<vmem>>, %arg11: memref<64x128xf32, #tpu.memory_space<vmem>>, %arg12: memref<1x128xf32, #tpu.memory_space<vmem>>, %arg13: memref<2x128xf32, #tpu.memory_space<vmem>>, %arg14: memref<1x128xi32, #tpu.memory_space<vmem>>, %arg15: memref<2x128xf32, #tpu.memory_space<vmem>>, %arg16: memref<8x64xf32, #tpu.memory_space<vmem>>) attributes {dimension_semantics = [#tpu.dimension_semantics<arbitrary>], iteration_bounds = array<i64: 1>, scalar_prefetch = 1 : i64, scratch_operands = 1 : i64, tpu.core_type = #tpu.core_type<tc>, window_params = [{pipeline_mode = #tpu.pipeline_mode<synchronous>, transform_indices = @transform_0, window_bounds = array<i64: 8, 32>}, {pipeline_mode = #tpu.pipeline_mode<synchronous>, transform_indices = @transform_1, window_bounds = array<i64: 32, 64>}, {pipeline_mode = #tpu.pipeline_mode<synchronous>, transform_indices = @transform_2, window_bounds = array<i64: 1, 64>}, {pipeline_mode = #tpu.pipeline_mode<synchronous>, transform_indices = @transform_3, window_bounds = array<i64: 64, 64>}, {pipeline_mode = #tpu.pipeline_mode<synchronous>, transform_indices = @transform_4, window_bounds = array<i64: 1, 64>}, {pipeline_mode = #tpu.pipeline_mode<synchronous>, transform_indices = @transform_5, window_bounds = array<i64: 18, 1, 512>}, {pipeline_mode = #tpu.pipeline_mode<synchronous>, transform_indices = @transform_6, window_bounds = array<i64: 128, 512>}, {pipeline_mode = #tpu.pipeline_mode<synchronous>, transform_indices = @transform_7, window_bounds = array<i64: 1, 512>}, {pipeline_mode = #tpu.pipeline_mode<synchronous>, transform_indices = @transform_8, window_bounds = array<i64: 128, 64>}, {pipeline_mode = #tpu.pipeline_mode<synchronous>, transform_indices = @transform_9, window_bounds = array<i64: 64, 128>}, {pipeline_mode = #tpu.pipeline_mode<synchronous>, transform_indices = @transform_10, window_bounds = array<i64: 1, 128>}, {pipeline_mode = #tpu.pipeline_mode<synchronous>, transform_indices = @transform_11, window_bounds = array<i64: 2, 128>}, {pipeline_mode = #tpu.pipeline_mode<synchronous>, transform_indices = @transform_12, window_bounds = array<i64: 1, 128>}, {pipeline_mode = #tpu.pipeline_mode<synchronous>, transform_indices = @transform_13, window_bounds = array<i64: 2, 128>}]} {
    %c0 = arith.constant 0 : index
    %0 = memref.load %arg1[%c0] : memref<2xi32, #tpu.memory_space<smem>>
    %c1 = arith.constant 1 : index
    %1 = memref.load %arg1[%c1] : memref<2xi32, #tpu.memory_space<smem>>
    %c8_i32 = arith.constant 8 : i32
    %2 = arith.minsi %1, %c8_i32 : i32
    %c0_0 = arith.constant 0 : index
    %c0_1 = arith.constant 0 : index
    %3 = vector.load %arg2[%c0_0, %c0_1] : memref<8x32xf32, #tpu.memory_space<vmem>>, vector<8x32xf32>
    %c0_2 = arith.constant 0 : index
    %c0_3 = arith.constant 0 : index
    %4 = vector.load %arg3[%c0_2, %c0_3] : memref<32x64xf32, #tpu.memory_space<vmem>>, vector<32x64xf32>
    %cst = arith.constant dense<0.000000e+00> : vector<8x64xf32>
    %5 = tpu.matmul %3, %4, %cst {dimension_numbers = #tpu.dot_dimension_numbers<[1], [0], [0], [1], [0, 0, 1, 1], [], []>} : vector<8x32xf32>, vector<32x64xf32>, vector<8x64xf32> -> vector<8x64xf32>
    %c0_4 = arith.constant 0 : index
    %c0_5 = arith.constant 0 : index
    %6 = vector.load %arg4[%c0_4, %c0_5] : memref<1x64xf32, #tpu.memory_space<vmem>>, vector<1x64xf32>
    %7 = vector.broadcast %6 : vector<1x64xf32> to vector<8x64xf32>
    %8 = arith.addf %5, %7 : vector<8x64xf32>
    %9 = math.tanh %8 : vector<8x64xf32>
    %c0_6 = arith.constant 0 : index
    %c0_7 = arith.constant 0 : index
    %10 = vector.load %arg5[%c0_6, %c0_7] : memref<64x64xf32, #tpu.memory_space<vmem>>, vector<64x64xf32>
    %cst_8 = arith.constant dense<0.000000e+00> : vector<8x64xf32>
    %11 = tpu.matmul %9, %10, %cst_8 {dimension_numbers = #tpu.dot_dimension_numbers<[1], [0], [0], [1], [0, 0, 1, 1], [], []>} : vector<8x64xf32>, vector<64x64xf32>, vector<8x64xf32> -> vector<8x64xf32>
    %c0_9 = arith.constant 0 : index
    %c0_10 = arith.constant 0 : index
    %12 = vector.load %arg6[%c0_9, %c0_10] : memref<1x64xf32, #tpu.memory_space<vmem>>, vector<1x64xf32>
    %13 = vector.broadcast %12 : vector<1x64xf32> to vector<8x64xf32>
    %14 = arith.addf %11, %13 : vector<8x64xf32>
    %c0_11 = arith.constant 0 : index
    %c0_12 = arith.constant 0 : index
    %15 = vector.load %arg16[%c0_11, %c0_12] : memref<8x64xf32, #tpu.memory_space<vmem>>, vector<8x64xf32>
    tpu.vector_store %arg16[%c0_11, %c0_12], %14 {strides = array<i32>} : memref<8x64xf32, #tpu.memory_space<vmem>>, vector<8x64xf32>,
    %16 = tpu.iota {dimensions = array<i32: 1>} : vector<1x128xi32>
    %c0_13 = arith.constant 0 : index
    %c0_14 = arith.constant 0 : index
    %17 = vector.load %arg13[%c0_13, %c0_14] : memref<2x128xf32, #tpu.memory_space<vmem>>, vector<1x128xf32>
    %c1_15 = arith.constant 1 : index
    %c0_16 = arith.constant 0 : index
    %18 = vector.load %arg13[%c1_15, %c0_16] : memref<2x128xf32, #tpu.memory_space<vmem>>, vector<1x128xf32>
    %c-1_i32 = arith.constant -1 : i32
    %19 = vector.broadcast %c-1_i32 : i32 to vector<1x128xi32>
    %c0_i32 = arith.constant 0 : i32
    %c0_i32_17 = arith.constant 0 : i32
    %20 = arith.subi %2, %c0_i32 : i32
    %21 = arith.addi %c0_i32, %20 : i32
    %c1_i32 = arith.constant 1 : i32
    %22:5 = scf.for %arg17 = %c0_i32 to %21 step %c1_i32 iter_args(%arg18 = %17, %arg19 = %18, %arg20 = %19, %arg21 = %0, %arg22 = %c0_i32_17) -> (vector<1x128xf32>, vector<1x128xf32>, vector<1x128xi32>, i32, i32)  : i32 {
      %26 = arith.index_cast %arg17 : i32 to index
      %c0_24 = arith.constant 0 : index
      %27 = vector.load %arg16[%26, %c0_24] : memref<8x64xf32, #tpu.memory_space<vmem>>, vector<1x64xf32>
      %c0_i32_25 = arith.constant 0 : i32
      %true = arith.constant true
      %28:7 = scf.while (%arg23 = %arg18, %arg24 = %arg19, %arg25 = %arg20, %arg26 = %arg21, %arg27 = %arg22, %arg28 = %c0_i32_25, %arg29 = %true) : (vector<1x128xf32>, vector<1x128xf32>, vector<1x128xi32>, i32, i32, i32, i1) -> (vector<1x128xf32>, vector<1x128xf32>, vector<1x128xi32>, i32, i32, i32, i1) {
        %c10_i32 = arith.constant 10 : i32
        %29 = arith.cmpi slt, %arg28, %c10_i32 : i32
        %30 = arith.andi %arg29, %29 : i1
        scf.condition(%30) %arg23, %arg24, %arg25, %arg26, %arg27, %arg28, %arg29 : vector<1x128xf32>, vector<1x128xf32>, vector<1x128xi32>, i32, i32, i32, i1
      } do {
      ^bb0(%arg23: vector<1x128xf32>, %arg24: vector<1x128xf32>, %arg25: vector<1x128xi32>, %arg26: i32, %arg27: i32, %arg28: i32, %arg29: i1):
        %c0_i32_26 = arith.constant 0 : i32
        %29 = arith.cmpi slt, %arg26, %c0_i32_26 : i32
        %c17_i32 = arith.constant 17 : i32
        %30 = arith.select %29, %c17_i32, %arg26 : i32
        %31 = arith.index_cast %30 : i32 to index
        %c0_27 = arith.constant 0 : index
        %c0_28 = arith.constant 0 : index
        %32 = vector.load %arg7[%31, %c0_27, %c0_28] : memref<18x1x512xf32, #tpu.memory_space<vmem>>, vector<1x1x512xf32>
        %33 = vector.shape_cast %32 : vector<1x1x512xf32> to vector<1x512xf32>
        %c0_29 = arith.constant 0 : index
        %c0_30 = arith.constant 0 : index
        %34 = vector.load %arg8[%c0_29, %c0_30] : memref<128x512xf32, #tpu.memory_space<vmem>>, vector<128x512xf32>
        %cst_31 = arith.constant dense<0.000000e+00> : vector<1x512xf32>
        %35 = tpu.matmul %arg23, %34, %cst_31 {dimension_numbers = #tpu.dot_dimension_numbers<[1], [0], [0], [1], [0, 0, 1, 1], [], []>} : vector<1x128xf32>, vector<128x512xf32>, vector<1x512xf32> -> vector<1x512xf32>
        %36 = arith.addf %33, %35 : vector<1x512xf32>
        %c0_32 = arith.constant 0 : index
        %c0_33 = arith.constant 0 : index
        %37 = vector.load %arg9[%c0_32, %c0_33] : memref<1x512xf32, #tpu.memory_space<vmem>>, vector<1x512xf32>
        %38 = arith.addf %36, %37 : vector<1x512xf32>
        %39 = vector.extract_strided_slice %38 {offsets = [0, 0], sizes = [1, 384], strides = [1, 1]} : vector<1x512xf32> to vector<1x384xf32>
        %40 = arith.negf %39 : vector<1x384xf32>
        %41 = math.exp %40 : vector<1x384xf32>
        %cst_34 = arith.constant 1.000000e+00 : f32
        %42 = vector.broadcast %cst_34 : f32 to vector<1x384xf32>
        %43 = arith.addf %42, %41 : vector<1x384xf32>
        %44 = arith.divf %42, %43 : vector<1x384xf32>
        %45 = vector.extract_strided_slice %44 {offsets = [0, 0], sizes = [1, 128], strides = [1, 1]} : vector<1x384xf32> to vector<1x128xf32>
        %46 = vector.extract_strided_slice %44 {offsets = [0, 128], sizes = [1, 128], strides = [1, 1]} : vector<1x384xf32> to vector<1x128xf32>
        %47 = vector.extract_strided_slice %44 {offsets = [0, 256], sizes = [1, 128], strides = [1, 1]} : vector<1x384xf32> to vector<1x128xf32>
        %48 = vector.extract_strided_slice %38 {offsets = [0, 384], sizes = [1, 128], strides = [1, 1]} : vector<1x512xf32> to vector<1x128xf32>
        %49 = math.tanh %48 : vector<1x128xf32>
        %50 = arith.mulf %46, %arg24 : vector<1x128xf32>
        %51 = arith.mulf %45, %49 : vector<1x128xf32>
        %52 = arith.addf %50, %51 : vector<1x128xf32>
        %53 = math.tanh %52 : vector<1x128xf32>
        %54 = arith.mulf %47, %53 : vector<1x128xf32>
        %c0_35 = arith.constant 0 : index
        %c0_36 = arith.constant 0 : index
        %55 = vector.load %arg10[%c0_35, %c0_36] : memref<128x64xf32, #tpu.memory_space<vmem>>, vector<128x64xf32>
        %cst_37 = arith.constant dense<0.000000e+00> : vector<1x64xf32>
        %56 = tpu.matmul %54, %55, %cst_37 {dimension_numbers = #tpu.dot_dimension_numbers<[1], [0], [0], [1], [0, 0, 1, 1], [], []>} : vector<1x128xf32>, vector<128x64xf32>, vector<1x64xf32> -> vector<1x64xf32>
        %57 = arith.addf %27, %56 : vector<1x64xf32>
        %cst_38 = arith.constant 0.000000e+00 : f32
        %58 = vector.broadcast %cst_38 : f32 to vector<1x64xf32>
        %59 = arith.maximumf %57, %58 : vector<1x64xf32>
        %c0_39 = arith.constant 0 : index
        %c0_40 = arith.constant 0 : index
        %60 = vector.load %arg11[%c0_39, %c0_40] : memref<64x128xf32, #tpu.memory_space<vmem>>, vector<64x128xf32>
        %cst_41 = arith.constant dense<0.000000e+00> : vector<1x128xf32>
        %61 = tpu.matmul %59, %60, %cst_41 {dimension_numbers = #tpu.dot_dimension_numbers<[1], [0], [0], [1], [0, 0, 1, 1], [], []>} : vector<1x64xf32>, vector<64x128xf32>, vector<1x128xf32> -> vector<1x128xf32>
        %c0_42 = arith.constant 0 : index
        %c0_43 = arith.constant 0 : index
        %62 = vector.load %arg12[%c0_42, %c0_43] : memref<1x128xf32, #tpu.memory_space<vmem>>, vector<1x128xf32>
        %63 = arith.addf %61, %62 : vector<1x128xf32>
        %cst_44 = arith.constant dense<0xFF800000> : vector<1xf32>
        %64 = vector.multi_reduction <maximumf>, %63, %cst_44 [1] : vector<1x128xf32> to vector<1xf32>
        %65 = vector.shape_cast %64 : vector<1xf32> to vector<1x1xf32>
        %66 = vector.broadcast %65 : vector<1x1xf32> to vector<1x128xf32>
        %67 = arith.cmpf oeq, %63, %66 : vector<1x128xf32>
        %c128_i32 = arith.constant 128 : i32
        %68 = vector.broadcast %c128_i32 : i32 to vector<1x128xi32>
        %69 = arith.select %67, %16, %68 : vector<1x128xi1>, vector<1x128xi32>
        %70 = vector.shape_cast %69 : vector<1x128xi32> to vector<1x1x128xi32>
        %cst_45 = arith.constant dense<2147483647> : vector<1xi32>
        %71 = vector.multi_reduction <minsi>, %70, %cst_45 [1, 2] : vector<1x1x128xi32> to vector<1xi32>
        %72 = vector.shape_cast %71 : vector<1xi32> to vector<1x1x1xi32>
        %73 = vector.extract %72[0, 0, 0] : i32 from vector<1x1x1xi32>
        %c16_i32 = arith.constant 16 : i32
        %74 = arith.cmpi ne, %73, %c16_i32 : i32
        %75 = vector.broadcast %arg27 : i32 to vector<1x128xi32>
        %76 = arith.cmpi eq, %16, %75 : vector<1x128xi32>
        %77 = vector.broadcast %74 : i1 to vector<1x128xi1>
        %78 = arith.andi %77, %76 : vector<1x128xi1>
        %79 = vector.broadcast %73 : i32 to vector<1x128xi32>
        %80 = arith.select %78, %79, %arg25 : vector<1x128xi1>, vector<1x128xi32>
        %81 = arith.select %74, %54, %arg23 : vector<1x128xf32>
        %82 = arith.select %74, %52, %arg24 : vector<1x128xf32>
        %83 = arith.select %74, %73, %arg26 : i32
        %84 = arith.extui %74 : i1 to i32
        %85 = arith.addi %arg27, %84 : i32
        %c1_i32_46 = arith.constant 1 : i32
        %86 = arith.addi %arg28, %c1_i32_46 : i32
        scf.yield %81, %82, %80, %83, %85, %86, %74 : vector<1x128xf32>, vector<1x128xf32>, vector<1x128xi32>, i32, i32, i32, i1
      }
      scf.yield %28#0, %28#1, %28#2, %28#3, %28#4 : vector<1x128xf32>, vector<1x128xf32>, vector<1x128xi32>, i32, i32
    }
    %c0_18 = arith.constant 0 : index
    %c0_19 = arith.constant 0 : index
    %23 = vector.load %arg14[%c0_18, %c0_19] : memref<1x128xi32, #tpu.memory_space<vmem>>, vector<1x128xi32>
    tpu.vector_store %arg14[%c0_18, %c0_19], %22#2 {strides = array<i32>} : memref<1x128xi32, #tpu.memory_space<vmem>>, vector<1x128xi32>,
    %c0_20 = arith.constant 0 : index
    %c0_21 = arith.constant 0 : index
    %24 = vector.load %arg15[%c0_20, %c0_21] : memref<2x128xf32, #tpu.memory_space<vmem>>, vector<1x128xf32>
    tpu.vector_store %arg15[%c0_20, %c0_21], %22#0 {strides = array<i32>} : memref<2x128xf32, #tpu.memory_space<vmem>>, vector<1x128xf32>,
    %c1_22 = arith.constant 1 : index
    %c0_23 = arith.constant 0 : index
    %25 = vector.load %arg15[%c1_22, %c0_23] : memref<2x128xf32, #tpu.memory_space<vmem>>, vector<1x128xf32>
    tpu.vector_store %arg15[%c1_22, %c0_23], %22#1 {strides = array<i32>} : memref<2x128xf32, #tpu.memory_space<vmem>>, vector<1x128xf32>,
    return
  }
  func.func @transform_0(%arg0: i32, %arg1: memref<2xi32, #tpu.memory_space<smem>>) -> (i32, i32) {
    %c0_i32 = arith.constant 0 : i32
    %c0_i32_0 = arith.constant 0 : i32
    %c0_i32_1 = arith.constant 0 : i32
    return %c0_i32, %c0_i32_0 : i32, i32
  }
  func.func @transform_1(%arg0: i32, %arg1: memref<2xi32, #tpu.memory_space<smem>>) -> (i32, i32) {
    %c0_i32 = arith.constant 0 : i32
    %c0_i32_0 = arith.constant 0 : i32
    %c0_i32_1 = arith.constant 0 : i32
    return %c0_i32, %c0_i32_0 : i32, i32
  }
  func.func @transform_2(%arg0: i32, %arg1: memref<2xi32, #tpu.memory_space<smem>>) -> (i32, i32) {
    %c0_i32 = arith.constant 0 : i32
    %c0_i32_0 = arith.constant 0 : i32
    %c0_i32_1 = arith.constant 0 : i32
    return %c0_i32, %c0_i32_0 : i32, i32
  }
  func.func @transform_3(%arg0: i32, %arg1: memref<2xi32, #tpu.memory_space<smem>>) -> (i32, i32) {
    %c0_i32 = arith.constant 0 : i32
    %c0_i32_0 = arith.constant 0 : i32
    %c0_i32_1 = arith.constant 0 : i32
    return %c0_i32, %c0_i32_0 : i32, i32
  }
  func.func @transform_4(%arg0: i32, %arg1: memref<2xi32, #tpu.memory_space<smem>>) -> (i32, i32) {
    %c0_i32 = arith.constant 0 : i32
    %c0_i32_0 = arith.constant 0 : i32
    %c0_i32_1 = arith.constant 0 : i32
    return %c0_i32, %c0_i32_0 : i32, i32
  }
  func.func @transform_5(%arg0: i32, %arg1: memref<2xi32, #tpu.memory_space<smem>>) -> (i32, i32, i32) {
    %c0_i32 = arith.constant 0 : i32
    %c0_i32_0 = arith.constant 0 : i32
    %c0_i32_1 = arith.constant 0 : i32
    %c0_i32_2 = arith.constant 0 : i32
    return %c0_i32, %c0_i32_0, %c0_i32_1 : i32, i32, i32
  }
  func.func @transform_6(%arg0: i32, %arg1: memref<2xi32, #tpu.memory_space<smem>>) -> (i32, i32) {
    %c0_i32 = arith.constant 0 : i32
    %c0_i32_0 = arith.constant 0 : i32
    %c0_i32_1 = arith.constant 0 : i32
    return %c0_i32, %c0_i32_0 : i32, i32
  }
  func.func @transform_7(%arg0: i32, %arg1: memref<2xi32, #tpu.memory_space<smem>>) -> (i32, i32) {
    %c0_i32 = arith.constant 0 : i32
    %c0_i32_0 = arith.constant 0 : i32
    %c0_i32_1 = arith.constant 0 : i32
    return %c0_i32, %c0_i32_0 : i32, i32
  }
  func.func @transform_8(%arg0: i32, %arg1: memref<2xi32, #tpu.memory_space<smem>>) -> (i32, i32) {
    %c0_i32 = arith.constant 0 : i32
    %c0_i32_0 = arith.constant 0 : i32
    %c0_i32_1 = arith.constant 0 : i32
    return %c0_i32, %c0_i32_0 : i32, i32
  }
  func.func @transform_9(%arg0: i32, %arg1: memref<2xi32, #tpu.memory_space<smem>>) -> (i32, i32) {
    %c0_i32 = arith.constant 0 : i32
    %c0_i32_0 = arith.constant 0 : i32
    %c0_i32_1 = arith.constant 0 : i32
    return %c0_i32, %c0_i32_0 : i32, i32
  }
  func.func @transform_10(%arg0: i32, %arg1: memref<2xi32, #tpu.memory_space<smem>>) -> (i32, i32) {
    %c0_i32 = arith.constant 0 : i32
    %c0_i32_0 = arith.constant 0 : i32
    %c0_i32_1 = arith.constant 0 : i32
    return %c0_i32, %c0_i32_0 : i32, i32
  }
  func.func @transform_11(%arg0: i32, %arg1: memref<2xi32, #tpu.memory_space<smem>>) -> (i32, i32) {
    %c0_i32 = arith.constant 0 : i32
    %c0_i32_0 = arith.constant 0 : i32
    %c0_i32_1 = arith.constant 0 : i32
    return %c0_i32, %c0_i32_0 : i32, i32
  }
  func.func @transform_12(%arg0: i32, %arg1: memref<2xi32, #tpu.memory_space<smem>>) -> (i32, i32) {
    %c0_i32 = arith.constant 0 : i32
    %c0_i32_0 = arith.constant 0 : i32
    %c0_i32_1 = arith.constant 0 : i32
    return %c0_i32, %c0_i32_0 : i32, i32
  }
  func.func @transform_13(%arg0: i32, %arg1: memref<2xi32, #tpu.memory_space<smem>>) -> (i32, i32) {
    %c0_i32 = arith.constant 0 : i32
    %c0_i32_0 = arith.constant 0 : i32
    %c0_i32_1 = arith.constant 0 : i32
    return %c0_i32, %c0_i32_0 : i32, i32
  }
}

</mosaic_0001>

<bundles_post_ra>
// kernel: _stt_forward_fused.1
= control target key start
LH: loop header
LB: loop body
LE: loop exit
PB: predicated region body
PF: predicated region fallthrough
CT: control target
= control target key end

     0   :  { %s1095_s16 = smov [#allocation4]   ;;  %s1457_s0 = inlined_call_operand.vmem [shape: s32[2], index: 0, kind: input, shape index: {}]   ;;  %s1458_s1 = inlined_call_operand.hbm [shape: f32[8,32], index: 1, kind: input, shape index: {}]   ;;  %s1459_s2 = inlined_call_operand.hbm [shape: f32[32,64], index: 2, kind: input, shape index: {}]   ;;  %s1460_s3 = inlined_call_operand.hbm [shape: f32[1,64], index: 3, kind: input, shape index: {}]   ;;  %s1461_s4 = inlined_call_operand.vmem [shape: f32[64,64], index: 4, kind: input, shape index: {}]   ;;  %s1462_s5 = inlined_call_operand.hbm [shape: f32[1,64], index: 5, kind: input, shape index: {}]   ;;  %s1463_s6 = inlined_call_operand.vmem [shape: f32[18,1,512], index: 6, kind: input, shape index: {}]   ;;  %s1464_s7 = inlined_call_operand.hbm [shape: f32[128,512], index: 7, kind: input, shape index: {}]   ;;  %s1465_s8 = inlined_call_operand.vmem [shape: f32[1,512], index: 8, kind: input, shape index: {}]   ;;  %s1466_s9 = inlined_call_operand.vmem [shape: f32[128,64], index: 9, kind: input, shape index: {}]   ;;  %s1467_s10 = inlined_call_operand.vmem [shape: f32[64,128], index: 10, kind: input, shape index: {}]   ;;  %s1468_s11 = inlined_call_operand.vmem [shape: f32[1,128], index: 11, kind: input, shape index: {}]   ;;  %s1469_s12 = inlined_call_operand.vmem [shape: f32[2,128], index: 12, kind: input, shape index: {}]   ;;  %s1470_s13 = inlined_call_operand.hbm [shape: s32[1,128], index: 13, kind: output, shape index: {0}]   ;;  %s1471_s14 = inlined_call_operand.hbm [shape: f32[2,128], index: 14, kind: output, shape index: {1}]  }
   0x1   :  { %s21_s15 = sshll.u32 %s1457_s0, 4  ;;  %s22_s15 = int_to_ptr.vmem [resolvable:$true] %s21_s15 }
   0x2   :  { %24 = dma.vmem_to_smem %s22_s15, 16, %s1095_s16, [#allocation3] }
   0x3   :  { %1023 = dma.done.wait [#allocation3], 16 }
   0x4   :  { %1024 = vsyncadd [#allocation3], 4294967280 }
   0x5   :  { %27 = sfence }
   0x6   :  { %28 = vsyncpa [#allocation6], 0 }
   0x7   :  { %29 = vsyncpa [#allocation9], 0 }
   0x8   :  { %30 = vsyncpa [#allocation12], 0 }
   0x9   :  { %31 = vsyncpa [#allocation7], 0  ;;  %s48_s19 = sshll.u32 %s1459_s2, 4  ;;  %s49_s19 = int_to_ptr.hbm [resolvable:$true] %s48_s19 }
   0xa   :  { %32 = vsyncpa [#allocation16], 0  ;;  %s1096_s20 = smov [#allocation8]   ;;  %s75_s23 = sshll.u32 %s1462_s5, 4  ;;  %s76_s23 = int_to_ptr.hbm [resolvable:$true] %s75_s23 }
   0xb   :  { %s50_s21 = sshll.u32 %s1096_s20, 4  ;;  %s1097_s24 = smov 128   ;;  %s51_s21 = int_to_ptr.vmem [resolvable:$true] %s50_s21 }
   0xc   :  { %s1098_s25 = smov 8   ;;  %s1099_s26 = smov [#allocation11]  }
   0xd   :  { %56 = dma.hbm_to_vmem [thread:$0]  %s49_s19, 512, %s51_s21, [#allocation9], %s1097_s24, %s1097_s24, %s1098_s25  }
   0xe   :  { %s77_s27 = sshll.u32 %s1099_s26, 4  ;;  %s38_s30 = sshll.u32 %s1458_s1, 4  ;;  %s78_s27 = int_to_ptr.vmem [resolvable:$true] %s77_s27  ;;  %s39_s30 = int_to_ptr.hbm [resolvable:$true] %s38_s30 }
   0xf   :  { %80 = dma.hbm_to_vmem [thread:$0]  %s76_s23, 16, %s78_s27, [#allocation12]  }
  0x10   :  { %s62_s16 = sshll.u32 %s1460_s3, 4  ;;  %s1100_s17 = smov [#allocation5]   ;;  %s63_s16 = int_to_ptr.hbm [resolvable:$true] %s62_s16 }
  0x11   :  { %s40_s18 = sshll.u32 %s1100_s17, 4  ;;  %s1101_s5 = smov [#allocation10]   ;;  %s41_s18 = int_to_ptr.vmem [resolvable:$true] %s40_s18 }
  0x12   :  { %43 = dma.hbm_to_vmem [thread:$0]  %s39_s30, 128, %s41_s18, [#allocation6]  }
  0x13   :  { %s64_s19 = sshll.u32 %s1101_s5, 4  ;;  %s87_s0 = sshll.u32 %s1464_s7, 4  ;;  %s65_s19 = int_to_ptr.vmem [resolvable:$true] %s64_s19  ;;  %s88_s0 = int_to_ptr.hbm [resolvable:$true] %s87_s0 }
  0x14   :  { %67 = dma.hbm_to_vmem [thread:$0]  %s63_s16, 16, %s65_s19, [#allocation9]  }
  0x15   :  { %s1102_s1 = smov [#allocation13]   ;;  %s1103_s23 = smov 512  }
  0x16   :  { %s89_s22 = sshll.u32 %s1102_s1, 4  ;;  %s1104_s24 = smov 32   ;;  %s90_s22 = int_to_ptr.vmem [resolvable:$true] %s89_s22 }
  0x17   :  { %95 = dma.hbm_to_vmem [thread:$0]  %s88_s0, 8192, %s90_s22, [#allocation12], %s1103_s23, %s1103_s23, %s1104_s24  }
  0x18   :  { %1025 = dma.done.wait [#allocation6], 128  }
  0x19   :  { %1026 = vsyncadd [#allocation6], 4294967168 }
  0x1a   :  { %1027 = dma.done.wait [#allocation9], 528  }
  0x1b   :  { %1028 = vsyncadd [#allocation9], 4294966768 }
  0x1c   :  { %1029 = dma.done.wait [#allocation12], 8208  }
  0x1d   :  { %1030 = vsyncadd [#allocation12], 4294959088  ;;  %s1200_s3 = sld [smem:[#allocation4]]   ;;  %v203_v0 = vld [vmem:[%s1469_s12] sm:$0x1]   ;;  %v134_v2 = vld [vmem:[#allocation8 + $0x18] sm:$0xff]  ;;  %v201_v19 = vlaneseq }
  0x1e   :  { %s1202_s25 = sld [smem:[#allocation4 + $0x1]]  ;;  %v204_v1 = vld [vmem:[%s1469_s12 + $0x1] sm:$0x1]   ;;  %155 = vmatpush.msra.mxu0 %v134_v2  ;;  %v132_v4 = vld [vmem:[#allocation8 + $0x8] sm:$0xff]  ;;  %v170_v6 = vld [vmem:[%s1461_s4 + $0x30] sm:$0xff]  ;;  %vm139_vm0 = vcmask 261120   ;;  %v1473_v26 = vmov %v203_v0 }
  0x1f   :  { %v133_v3 = vld [vmem:[#allocation8 + $0x10] sm:$0xff]  ;;  %v171_v5 = vld [vmem:[%s1461_s4 + $0x38] sm:$0xff]  ;;  %v131_v7 = vld [vmem:[#allocation8] sm:$0xff]  ;;  %vm176_vm1 = vcmask 523264   ;;  %v1239_v20 = vand.u32 127, %v201_v19  ;;  %v1243_v24 = vmov 4294967295   ;;  %v1472_v25 = vmov %v204_v1 }
  0x20   :  { %156 = vmatpush.msra.mxu0 %v133_v3  ;;  %188 = vmatpush.msra.mxu1 %v171_v5  ;;  %v169_v8 = vld [vmem:[%s1461_s4 + $0x28] sm:$0xff]  ;;  %v168_v10 = vld [vmem:[%s1461_s4 + $0x20] sm:$0xff]  ;;  %v167_v11 = vld [vmem:[%s1461_s4 + $0x18] sm:$0xff] }
  0x21   :  { %v130_v9 = vld [vmem:[#allocation5] sm:$0xff]  ;;  %v166_v12 = vld [vmem:[%s1461_s4 + $0x10] sm:$0xff]  ;;  %v164_v14 = vld [vmem:[%s1461_s4] sm:$0xff] }
  0x22   :  { %157 = vmatpush.msra.mxu0 %v132_v4  ;;  %189 = vmatpush.msra.mxu1 %v170_v6  ;;  %v165_v13 = vld [vmem:[%s1461_s4 + $0x8] sm:$0xff]  ;;  %v771_v15 = vld [vmem:[#allocation10] ss:$0 sm:$0xff]  ;;  %v772_v21 = vld [vmem:[#allocation11] ss:$0 sm:$0xff] }
  0x24   :  { %p128_p0 = scmp.lt.s32.totalorder %s1202_s25, 8  ;;  %158 = vmatpush.msra.mxu0 %v131_v7  ;;  %190 = vmatpush.msra.mxu1 %v169_v8  ;;  %p634_p1 = scmp.le.s32.totalorder %s1202_s25, 0 }
  0x25   :  { %628 = vmatmul.msk.f32.vlgmr.msra.gmra.mxu0 %vm139_vm0, %v130_v9  ;;  %s1249_s4 = smov (!%p634_p1), 0   ;;  %s1260_s7 = smov (!%p634_p1), 0  }
  0x26   :  { %s1218_s16 = scalar_select %p128_p0, %s1202_s25, 8  ;;  %191 = vmatpush.msra.mxu1 %v168_v10 }
  0x28   :  { %192 = vmatpush.msra.mxu1 %v167_v11 }
  0x2a   :  { %193 = vmatpush.msra.mxu1 %v166_v12 }
  0x2c   :  { %194 = vmatpush.msra.mxu1 %v165_v13 }
  0x2e   :  { %195 = vmatpush.msra.mxu1 %v164_v14 }
  0xa2   :  { %v160_v16 = vpop.f32.mrf.mxu0 }
  0xa3   :  { %v161_v17 = vadd.f32 %v771_v15, %v160_v16 }
  0xa5   :  { %773 = vtanh.f32 %v161_v17 }
  0xab   :  { %v774_v18 = vpop.eup %773 }
  0xac   :  { %629 = vmatmul.msk.f32.vlgmr.msra.gmra.mxu1 %vm176_vm1, %v774_v18 }
 0x128   :  { %614 = sbr.rel (%p634_p1) target bundleno = 1221 (0x4c5), region = 117 }
 0x129   :  { %v197_v22 = vpop.f32.mrf.mxu1 }
 0x12a   :  { %v198_v23 = vadd.f32 %v772_v21, %v197_v22 }
 0x12c   :  { %200 = vst.msk [vmem:[#allocation2] sm:$0xff] %vm176_vm1, %v198_v23 }
 0x12d   :  { %v1254_v27 = vmov 4294967295  }
 0x12e LB: > { %s216_s25 = scalar_lea.vmem [#allocation2], %s1057_s7  ;;  %s1273_s26 = smov 0   ;;  %s1057_s7 = sphi %s1260_s7, %s208_s7   ;;  %v1053_v0 = vphi %v203_v0, %v1484_v0   ;;  %v1049_v1 = vphi %v204_v1, %v1483_v1   ;;  %v1045_v27 = vphi %v1254_v27, %v1482_v27   ;;  %s1041_s3 = sphi %s1200_s3, %s1481_s3   ;;  %s1037_s4 = sphi %s1249_s4, %s1480_s4  }
 0x133   : > { %v1271_v28 = vld [vmem:[%s216_s25] sm:$0x1] }
 0x134 LB: >> { %v298_v29 = vld [vmem:[#allocation13 + $0x1f0] sm:$0xff]  ;;  %v299_v30 = vld [vmem:[#allocation13 + $0x1f8] sm:$0xff]  ;;  %v297_v35 = vld [vmem:[#allocation13 + $0x1e8] sm:$0xff]  ;;  %p231_p2 = scmp.lt.s32.totalorder %s1069_s3, 0  ;;  %vm387_vm2 = vcmask 1040384   ;;  %vm389_vm3 = vcmask 1042434   ;;  %v1081_v0 = vphi %v1053_v0, %v1479_v0   ;;  %v1077_v1 = vphi %v1049_v1, %v1478_v1   ;;  %v1073_v27 = vphi %v1045_v27, %v1477_v27   ;;  %s1069_s3 = sphi %s1041_s3, %s1476_s3   ;;  %s1065_s4 = sphi %s1037_s4, %s1475_s4   ;;  %s1061_s26 = sphi %s1273_s26, %s1474_s26  }
 0x135   : >> { %v294_v31 = vld [vmem:[#allocation13 + $0x1d0] sm:$0xff]  ;;  %340 = vmatpush.msra.mxu2 %v298_v29  ;;  %360 = vmatpush.msra.mxu3 %v299_v30  ;;  %v295_v32 = vld [vmem:[#allocation13 + $0x1d8] sm:$0xff]  ;;  %v296_v36 = vld [vmem:[#allocation13 + $0x1e0] sm:$0xff]  ;;  %vm391_vm4 = vcmask 1041408   ;;  %s543_s27 = sadd.s32 1, %s1061_s26  }
 0x136   : >> { %v290_v33 = vld [vmem:[#allocation13 + $0x1b0] sm:$0xff]  ;;  %v291_v34 = vld [vmem:[#allocation13 + $0x1b8] sm:$0xff]  ;;  %v293_v37 = vld [vmem:[#allocation13 + $0x1c8] sm:$0xff]  ;;  %320 = vmatpush.msra.mxu1 %v297_v35  ;;  %300 = vmatpush.msra.mxu0 %v296_v36  ;;  %s232_s17 = scalar_select %p231_p2, 17, %s1069_s3 }
 0x137   : >> { %341 = vmatpush.msra.mxu2 %v294_v31  ;;  %361 = vmatpush.msra.mxu3 %v295_v32  ;;  %v286_v38 = vld [vmem:[#allocation13 + $0x190] sm:$0xff]  ;;  %v287_v39 = vld [vmem:[#allocation13 + $0x198] sm:$0xff]  ;;  %v292_v40 = vld [vmem:[#allocation13 + $0x1c0] sm:$0xff]  ;;  %p226_p4 = scmp.lt.s32.totalorder %s543_s27, 10  ;;  %s1474_s26 = smov %s543_s27 }
 0x138   : >> { %v289_v41 = vld [vmem:[#allocation13 + $0x1a8] sm:$0xff]  ;;  %v288_v42 = vld [vmem:[#allocation13 + $0x1a0] sm:$0xff]  ;;  %321 = vmatpush.msra.mxu1 %v293_v37  ;;  %v282_v43 = vld [vmem:[#allocation13 + $0x170] sm:$0xff]  ;;  %301 = vmatpush.msra.mxu0 %v292_v40  ;;  %s631_s20 = sshll.u32 %s232_s17, 2 }
 0x139   : >> { %342 = vmatpush.msra.mxu2 %v290_v33  ;;  %362 = vmatpush.msra.mxu3 %v291_v34  ;;  %v283_v44 = vld [vmem:[#allocation13 + $0x178] sm:$0xff]  ;;  %v285_v45 = vld [vmem:[#allocation13 + $0x188] sm:$0xff]  ;;  %v284_v46 = vld [vmem:[#allocation13 + $0x180] sm:$0xff]  ;;  %s234_s25 = scalar_lea.vmem %s1463_s6, %s631_s20 }
 0x13a   : >> { %322 = vmatpush.msra.mxu1 %v289_v41  ;;  %v278_v47 = vld [vmem:[#allocation13 + $0x150] sm:$0xff]  ;;  %v279_v48 = vld [vmem:[#allocation13 + $0x158] sm:$0xff]  ;;  %302 = vmatpush.msra.mxu0 %v288_v42  ;;  %v281_v49 = vld [vmem:[#allocation13 + $0x168] sm:$0xff] }
 0x13b   : >> { %343 = vmatpush.msra.mxu2 %v286_v38  ;;  %363 = vmatpush.msra.mxu3 %v287_v39  ;;  %v280_v50 = vld [vmem:[#allocation13 + $0x160] sm:$0xff]  ;;  %v274_v51 = vld [vmem:[#allocation13 + $0x130] sm:$0xff]  ;;  %v275_v52 = vld [vmem:[#allocation13 + $0x138] sm:$0xff] }
 0x13c   : >> { %323 = vmatpush.msra.mxu1 %v285_v45  ;;  %303 = vmatpush.msra.mxu0 %v284_v46  ;;  %v277_v53 = vld [vmem:[#allocation13 + $0x148] sm:$0xff]  ;;  %v276_v54 = vld [vmem:[#allocation13 + $0x140] sm:$0xff]  ;;  %v270_v55 = vld [vmem:[#allocation13 + $0x110] sm:$0xff] }
 0x13d   : >> { %344 = vmatpush.msra.mxu2 %v282_v43  ;;  %364 = vmatpush.msra.mxu3 %v283_v44  ;;  %v271_v56 = vld [vmem:[#allocation13 + $0x118] sm:$0xff]  ;;  %v273_v57 = vld [vmem:[#allocation13 + $0x128] sm:$0xff]  ;;  %v272_v58 = vld [vmem:[#allocation13 + $0x120] sm:$0xff] }
 0x13e   : >> { %324 = vmatpush.msra.mxu1 %v281_v49  ;;  %304 = vmatpush.msra.mxu0 %v280_v50  ;;  %v266_v59 = vld [vmem:[#allocation13 + $0xf0] sm:$0xff]  ;;  %v267_v60 = vld [vmem:[#allocation13 + $0xf8] sm:$0xff]  ;;  %v269_v61 = vld [vmem:[#allocation13 + $0x108] sm:$0xff] }
 0x13f   : >> { %345 = vmatpush.msra.mxu2 %v278_v47  ;;  %365 = vmatpush.msra.mxu3 %v279_v48  ;;  %v268_v62 = vld [vmem:[#allocation13 + $0x100] sm:$0xff]  ;;  %v262_v63 = vld [vmem:[#allocation13 + $0xd0] sm:$0xff]  ;;  %v263_v2 = vld [vmem:[#allocation13 + $0xd8] sm:$0xff] }
 0x140   : >> { %325 = vmatpush.msra.mxu1 %v277_v53  ;;  %305 = vmatpush.msra.mxu0 %v276_v54  ;;  %v265_v3 = vld [vmem:[#allocation13 + $0xe8] sm:$0xff]  ;;  %v264_v4 = vld [vmem:[#allocation13 + $0xe0] sm:$0xff]  ;;  %v258_v5 = vld [vmem:[#allocation13 + $0xb0] sm:$0xff] }
 0x141   : >> { %346 = vmatpush.msra.mxu2 %v274_v51  ;;  %366 = vmatpush.msra.mxu3 %v275_v52  ;;  %v259_v6 = vld [vmem:[#allocation13 + $0xb8] sm:$0xff]  ;;  %v261_v7 = vld [vmem:[#allocation13 + $0xc8] sm:$0xff]  ;;  %v260_v8 = vld [vmem:[#allocation13 + $0xc0] sm:$0xff] }
 0x142   : >> { %326 = vmatpush.msra.mxu1 %v273_v57  ;;  %306 = vmatpush.msra.mxu0 %v272_v58  ;;  %v254_v9 = vld [vmem:[#allocation13 + $0x90] sm:$0xff]  ;;  %v255_v10 = vld [vmem:[#allocation13 + $0x98] sm:$0xff]  ;;  %v257_v11 = vld [vmem:[#allocation13 + $0xa8] sm:$0xff] }
 0x143   : >> { %347 = vmatpush.msra.mxu2 %v270_v55  ;;  %367 = vmatpush.msra.mxu3 %v271_v56  ;;  %v256_v12 = vld [vmem:[#allocation13 + $0xa0] sm:$0xff]  ;;  %v250_v13 = vld [vmem:[#allocation13 + $0x70] sm:$0xff]  ;;  %v251_v14 = vld [vmem:[#allocation13 + $0x78] sm:$0xff] }
 0x144   : >> { %327 = vmatpush.msra.mxu1 %v269_v61  ;;  %307 = vmatpush.msra.mxu0 %v268_v62  ;;  %v253_v15 = vld [vmem:[#allocation13 + $0x88] sm:$0xff]  ;;  %v252_v16 = vld [vmem:[#allocation13 + $0x80] sm:$0xff]  ;;  %v246_v17 = vld [vmem:[#allocation13 + $0x50] sm:$0xff] }
 0x145   : >> { %348 = vmatpush.msra.mxu2 %v266_v59  ;;  %368 = vmatpush.msra.mxu3 %v267_v60  ;;  %v247_v18 = vld [vmem:[#allocation13 + $0x58] sm:$0xff]  ;;  %v249_v19 = vld [vmem:[#allocation13 + $0x68] sm:$0xff]  ;;  %v248_v21 = vld [vmem:[#allocation13 + $0x60] sm:$0xff] }
 0x146   : >> { %328 = vmatpush.msra.mxu1 %v265_v3  ;;  %308 = vmatpush.msra.mxu0 %v264_v4  ;;  %v242_v22 = vld [vmem:[#allocation13 + $0x30] sm:$0xff]  ;;  %v243_v23 = vld [vmem:[#allocation13 + $0x38] sm:$0xff]  ;;  %v245_v24 = vld [vmem:[#allocation13 + $0x48] sm:$0xff] }
 0x147   : >> { %349 = vmatpush.msra.mxu2 %v262_v63  ;;  %369 = vmatpush.msra.mxu3 %v263_v2  ;;  %v244_v25 = vld [vmem:[#allocation13 + $0x40] sm:$0xff]  ;;  %v238_v26 = vld [vmem:[#allocation13 + $0x10] sm:$0xff]  ;;  %v239_v29 = vld [vmem:[#allocation13 + $0x18] sm:$0xff] }
 0x148   : >> { %329 = vmatpush.msra.mxu1 %v261_v7  ;;  %309 = vmatpush.msra.mxu0 %v260_v8  ;;  %v241_v30 = vld [vmem:[#allocation13 + $0x28] sm:$0xff]  ;;  %v240_v31 = vld [vmem:[#allocation13 + $0x20] sm:$0xff]  ;;  %v443_v36 = vld [vmem:[%s1466_s9 + $0x68] sm:$0xff] }
 0x149   : >> { %350 = vmatpush.msra.mxu2 %v258_v5  ;;  %370 = vmatpush.msra.mxu3 %v259_v6  ;;  %v237_v32 = vld [vmem:[#allocation13 + $0x8] sm:$0xff]  ;;  %v236_v33 = vld [vmem:[#allocation13] sm:$0xff]  ;;  %v439_v42 = vld [vmem:[%s1466_s9 + $0x48] sm:$0xff] }
 0x14a   : >> { %330 = vmatpush.msra.mxu1 %v257_v11  ;;  %310 = vmatpush.msra.mxu0 %v256_v12  ;;  %v445_v34 = vld [vmem:[%s1466_s9 + $0x78] sm:$0xff]  ;;  %v444_v35 = vld [vmem:[%s1466_s9 + $0x70] sm:$0xff]  ;;  %v442_v37 = vld [vmem:[%s1466_s9 + $0x60] sm:$0xff] }
 0x14b   : >> { %351 = vmatpush.msra.mxu2 %v254_v9  ;;  %371 = vmatpush.msra.mxu3 %v255_v10  ;;  %v441_v38 = vld [vmem:[%s1466_s9 + $0x58] sm:$0xff]  ;;  %v440_v39 = vld [vmem:[%s1466_s9 + $0x50] sm:$0xff]  ;;  %v438_v46 = vld [vmem:[%s1466_s9 + $0x40] sm:$0xff] }
 0x14c   : >> { %331 = vmatpush.msra.mxu1 %v253_v15  ;;  %311 = vmatpush.msra.mxu0 %v252_v16  ;;  %v235_v50 = vld [vmem:[%s234_s25] sm:$0xf]  ;;  %v437_v51 = vld [vmem:[%s1466_s9 + $0x38] sm:$0xff]  ;;  %v436_v55 = vld [vmem:[%s1466_s9 + $0x30] sm:$0xff] }
 0x14d   : >> { %352 = vmatpush.msra.mxu2 %v250_v13  ;;  %372 = vmatpush.msra.mxu3 %v251_v14  ;;  %v395_v54 = vld [vmem:[%s1465_s8] sm:$0xf]  ;;  %v435_v57 = vld [vmem:[%s1466_s9 + $0x28] sm:$0xff]  ;;  %v433_v61 = vld [vmem:[%s1466_s9 + $0x18] sm:$0xff] }
 0x14e   : >> { %332 = vmatpush.msra.mxu1 %v249_v19  ;;  %312 = vmatpush.msra.mxu0 %v248_v21  ;;  %v434_v59 = vld [vmem:[%s1466_s9 + $0x20] sm:$0xff]  ;;  %v432_v62 = vld [vmem:[%s1466_s9 + $0x10] sm:$0xff]  ;;  %v431_v63 = vld [vmem:[%s1466_s9 + $0x8] sm:$0xff] }
 0x14f   : >> { %353 = vmatpush.msra.mxu2 %v246_v17  ;;  %373 = vmatpush.msra.mxu3 %v247_v18  ;;  %v430_v2 = vld [vmem:[%s1466_s9] sm:$0xff]  ;;  %v475_v5 = vld [vmem:[%s1467_s10 + $0x38] sm:$0xff]  ;;  %v474_v6 = vld [vmem:[%s1467_s10 + $0x30] sm:$0xff] }
 0x150   : >> { %333 = vmatpush.msra.mxu1 %v245_v24  ;;  %313 = vmatpush.msra.mxu0 %v244_v25  ;;  %v473_v7 = vld [vmem:[%s1467_s10 + $0x28] sm:$0xff]  ;;  %v472_v8 = vld [vmem:[%s1467_s10 + $0x20] sm:$0xff]  ;;  %v471_v10 = vld [vmem:[%s1467_s10 + $0x18] sm:$0xff] }
 0x151   : >> { %354 = vmatpush.msra.mxu2 %v242_v22  ;;  %374 = vmatpush.msra.mxu3 %v243_v23 }
 0x152   : >> { %334 = vmatpush.msra.mxu1 %v241_v30  ;;  %314 = vmatpush.msra.mxu0 %v240_v31 }
 0x153   : >> { %355 = vmatpush.msra.mxu2 %v238_v26  ;;  %375 = vmatpush.msra.mxu3 %v239_v29 }
 0x154   : >> { %356 = vmatmul.f32.vlgmr.msra.gmra.mxu2 %v1081_v0  ;;  %376 = vmatmul.f32.vlgmr.msra.gmra.mxu3 %v1081_v0 }
 0x155   : >> { %335 = vmatpush.msra.mxu1 %v237_v32  ;;  %315 = vmatpush.msra.mxu0 %v236_v33  ;;  %v470_v32 = vld [vmem:[%s1467_s10 + $0x10] sm:$0xff]  ;;  %v469_v33 = vld [vmem:[%s1467_s10 + $0x8] sm:$0xff] }
 0x156   : >> { %336 = vmatmul.f32.vlgmr.msra.gmra.mxu1 %v1081_v0  ;;  %316 = vmatmul.f32.vlgmr.msra.gmra.mxu0 %v1081_v0 }
 0x157   : >> { %446 = vmatpush.msrb.mxu0 %v445_v34  ;;  %488 = vmatpush.msrb.mxu1 %v475_v5  ;;  %v468_v34 = vld [vmem:[%s1467_s10] sm:$0xff] }
 0x159   : >> { %447 = vmatpush.msrb.mxu0 %v444_v35  ;;  %489 = vmatpush.msrb.mxu1 %v474_v6 }
 0x15b   : >> { %448 = vmatpush.msrb.mxu0 %v443_v36  ;;  %490 = vmatpush.msrb.mxu1 %v473_v7 }
 0x15d   : >> { %449 = vmatpush.msrb.mxu0 %v442_v37  ;;  %491 = vmatpush.msrb.mxu1 %v472_v8 }
 0x15f   : >> { %450 = vmatpush.msrb.mxu0 %v441_v38  ;;  %492 = vmatpush.msrb.mxu1 %v471_v10  ;;  %v476_v38 = vld [vmem:[%s1468_s11] sm:$0x1] }
 0x161   : >> { %451 = vmatpush.msrb.mxu0 %v440_v39  ;;  %493 = vmatpush.msrb.mxu1 %v470_v32 }
 0x163   : >> { %452 = vmatpush.msrb.mxu0 %v439_v42  ;;  %494 = vmatpush.msrb.mxu1 %v469_v33 }
 0x165   : >> { %453 = vmatpush.msrb.mxu0 %v438_v46  ;;  %495 = vmatpush.msrb.mxu1 %v468_v34 }
 0x167   : >> { %454 = vmatpush.msrb.mxu0 %v437_v51 }
 0x169   : >> { %455 = vmatpush.msrb.mxu0 %v436_v55 }
 0x16b   : >> { %456 = vmatpush.msrb.mxu0 %v435_v57 }
 0x16d   : >> { %457 = vmatpush.msrb.mxu0 %v434_v59 }
 0x16f   : >> { %458 = vmatpush.msrb.mxu0 %v433_v61 }
 0x171   : >> { %459 = vmatpush.msrb.mxu0 %v432_v62  ;;  %v531_v62 = vstv %s1065_s4 }
 0x172   : >> { %vm532_vm14 = vcmp.eq.s32.totalorder %v1239_v20, %v531_v62 }
 0x173   : >> { %460 = vmatpush.msrb.mxu0 %v431_v63 }
 0x175   : >> { %461 = vmatpush.msrb.mxu0 %v430_v2 }
 0x1d3   : >> { %v337_v40 = vpop.f32.mrf.mxu1  ;;  %v317_v41 = vpop.f32.mrf.mxu0 }
 0x1d4   : >> { %v384_v43 = vrot.slane %v337_v40, 7 }
 0x1d6   : >> { %v388_v49 = vsel %vm387_vm2, %v317_v41, %v384_v43 }
 0x1d7   : >> { %v357_v44 = vpop.f32.mrf.mxu2  ;;  %v377_v45 = vpop.f32.mrf.mxu3 }
 0x1d8   : >> { %v385_v47 = vrot.slane %v357_v44, 6  ;;  %v386_v48 = vrot.slane %v377_v45, 5 }
 0x1da   : >> { %v390_v52 = vsel %vm389_vm3, %v385_v47, %v386_v48 }
 0x1db   : >> { %v392_v53 = vsel %vm391_vm4, %v388_v49, %v390_v52 }
 0x1dc   : >> { %v394_v56 = vadd.f32 %v392_v53, %v235_v50 }
 0x1de   : >> { %v396_v58 = vadd.f32 %v395_v54, %v394_v56 }
 0x1e0   : >> { %v632_v60 = vmul.f32 -1.442695, %v396_v58  ;;  %v417_v12 = vrot.slane %v396_v58, 3 }
 0x1e2   : >> { %775 = vpow2.f32 %v632_v60 }
 0x1e8   : >> { %v776_v3 = vpop.eup %775 }
 0x1e9   : >> { %v400_v4 = vadd.f32 1.0, %v776_v3 }
 0x1eb   : >> { %777 = vrcp.f32 %v400_v4  ;;  %v412_v14 = vand.u32 2147483648, %v400_v4  ;;  %v410_v16 = vand.u32 2147483647, %v400_v4  ;;  %vm406_vm6 = vweird.f32 %v400_v4 }
 0x1ec   : >> { %779 = vtanh.f32 %v417_v12 }
 0x1ed   : >> { %v413_v18 = vor.u32 1.1754944e-38, %v412_v14  ;;  %vm411_vm8 = vcmp.eq.f32.partialorder %v410_v16, 8.507059e+37 }
 0x1f1   : >> { %v778_v9 = vpop.eup %777 }
 0x1f2   : >> { %v402_v11 = vmul.f32 %v778_v9, %v400_v4  ;;  %vm407_vm5 = vweird.f32 %v778_v9  ;;  %v780_v23 = vpop.eup %779 }
 0x1f3   : >> { %vm408_vm7 = vmor %vm406_vm6, %vm407_vm5 }
 0x1f4   : >> { %v403_v13 = vsub.f32 1.0, %v402_v11 }
 0x1f6   : >> { %v404_v15 = vmul.f32 %v778_v9, %v403_v13 }
 0x1f8   : >> { %v405_v17 = vadd.f32 %v778_v9, %v404_v15 }
 0x1fa   : >> { %v409_v19 = vsel %vm408_vm7, %v778_v9, %v405_v17 }
 0x1fb   : >> { %v414_v21 = vsel %vm411_vm8, %v413_v18, %v409_v19 }
 0x1fc   : >> { %v421_v22 = vrot.slane %v414_v21, 1  ;;  %v424_v25 = vmul.f32 %v780_v23, %v414_v21  ;;  %v427_v29 = vrot.slane %v414_v21, 2 }
 0x1fe   : >> { %v423_v24 = vmul.f32 %v1077_v1, %v421_v22 }
 0x200   : >> { %v1380_v26 = vadd.f32 %v424_v25, %v423_v24 }
 0x202   : >> { %781 = vtanh.f32 %v1380_v26 }
 0x208   : >> { %v782_v30 = vpop.eup %781 }
 0x209   : >> { %v429_v31 = vmul.f32 %v782_v30, %v427_v29 }
 0x20b   : >> { %462 = vmatmul.f32.vlgmr.msrb.gmra.mxu0 %v429_v31 }
 0x288   : >> { %v463_v35 = vpop.f32.mrf.mxu0 }
 0x289   : >> { %v466_v36 = vadd.f32 %v463_v35, %v1271_v28 }
 0x28b   : >> { %v467_v37 = vmax.f32 %v466_v36, 0.0 }
 0x28d   : >> { %633 = vmatmul.msk.f32.vlgmr.msrb.gmra.mxu1 %vm176_vm1, %v467_v37 }
 0x30a   : >> { %v497_v39 = vpop.f32.mrf.mxu1 }
 0x30b   : >> { %v498_v40 = vadd.f32 %v497_v39, %v476_v38 }
 0x30d   : >> { %v500_v41 = vsel %vm387_vm2, %v498_v40, -inf }
 0x30e   : >> { %501 = vmax.xlane.f32.xlu0 %v500_v41 }
 0x381   : >> { %v502_v42 = vpop.xlane.xlu0 %501 }
 0x382   : >> { %vm503_vm9 = vcmp.eq.f32.partialorder %v498_v40, %v502_v42 }
 0x383   : >> { %v504_v43 = vsel %vm503_vm9, %v1239_v20, 128 }
 0x384   : >> { %v505_v44 = vsel %vm387_vm2, %v504_v43, 2147483647 }
 0x385   : >> { %v507_v45 = vshra.s32 %v505_v44, 16  ;;  %v506_v47 = vand.u32 65535, %v505_v44 }
 0x387   : >> { %v509_v46 = vcvt.s32.f32 %v507_v45  ;;  %v508_v49 = vcvt.s32.f32 %v506_v47 }
 0x389   : >> { %510 = vmin.xlane.f32.xlu0 %v509_v46 }
 0x3fc   : >> { %v511_v48 = vpop.xlane.xlu0 %510 }
 0x3fd   : >> { %vm512_vm10 = vcmp.eq.f32.partialorder %v509_v46, %v511_v48  ;;  %v517_v51 = vcvt.f32.s32 %v511_v48 }
 0x3fe   : >> { %v513_v50 = vsel %vm512_vm10, %v508_v49, inf }
 0x3ff   : >> { %514 = vmin.xlane.f32.xlu1 %v513_v50  ;;  %v518_v53 = vshll.u32 %v517_v51, 16 }
 0x472   : >> { %v515_v52 = vpop.xlane.xlu1 %514 }
 0x473   : >> { %v516_v54 = vcvt.f32.s32 %v515_v52 }
 0x475   : >> { %v519_v55 = vadd.s32 %v518_v53, %v516_v54 }
 0x477   : >> { %v520_v56 = vrot.slane %v519_v55, 4 }
 0x479   : >> { %vm521_vm11 = vcmp.lt.s32.totalorder %v519_v55, %v520_v56 }
 0x47a   : >> { %v522_v57 = vsel %vm521_vm11, %v519_v55, %v520_v56 }
 0x47b   : >> { %v523_v58 = vrot.slane %v522_v57, 2 }
 0x47d   : >> { %vm524_vm12 = vcmp.lt.s32.totalorder %v522_v57, %v523_v58 }
 0x47e   : >> { %v525_v59 = vsel %vm524_vm12, %v522_v57, %v523_v58 }
 0x47f   : >> { %v526_v60 = vrot.slane %v525_v59, 1 }
 0x481   : >> { %vm527_vm13 = vcmp.lt.s32.totalorder %v525_v59, %v526_v60 }
 0x482   : >> { %v528_v61 = vsel %vm527_vm13, %v525_v59, %v526_v60 }
 0x483   : >> { %637 = vpush %v528_v61 }
 0x4b4   : >> { %s638_s28 = spop %637 }
 0x4b5   : >> { %p530_p3 = scmp.ne.s32.totalorder %s638_s28, 16  ;;  %v537_v2 = vstv %s638_s28 }
 0x4b7   : >> { %s533_s29 = scalar_select %p530_p3, 1, 0 }
 0x4b8   : >> { %s541_s30 = scalar_select %p530_p3, %s638_s28, %s1069_s3  }
 0x4b9   : >> { %v534_v63 = vstv %s533_s29  ;;  %s542_s2 = sadd.s32 %s1065_s4, %s533_s29   ;;  %p227_p5 = pnand %p530_p3, %p226_p4 }
 0x4ba   : >> { %vm535_vm15 = vcmp.eq.s32.totalorder %v534_v63, 1  ;;  %s1475_s4 = smov %s542_s2  ;;  %s1476_s3 = smov %s541_s30 }
 0x4bb   : >> { %vm536_vm0 = vmand %vm535_vm15, %vm532_vm14  ;;  %v539_v3 = vsel %vm535_vm15, %v429_v31, %v1081_v0   ;;  %v540_v4 = vsel %vm535_vm15, %v1380_v26, %v1077_v1   ;;  %230 = sbr.rel (!%p227_p5) target bundleno = 308 (0x134), region = 112  ;;  %s208_s7 = sadd.s32 (%p227_p5), 1, %s1057_s7  }
 0x4bc   : >> { %v538_v5 = vsel %vm536_vm0, %v537_v2, %v1073_v27   ;;  %v1478_v1 = vmov %v540_v4  ;;  %v1479_v0 = vmov %v539_v3  ;;  %p207_p6 = scmp.ge.s32.totalorder (%p227_p5), %s208_s7, %s1218_s16  ;;  %s1480_s4 = smov (%p227_p5), %s542_s2 }
 0x4bd   : >> { %v1477_v27 = vmov %v538_v5  ;;  %s1481_s3 = smov (%p227_p5), %s541_s30  ;;  %v1483_v1 = vmov (%p227_p5), %v540_v4  ;;  %v1484_v0 = vmov (%p227_p5), %v539_v3 }
 0x4be   : > { %v1482_v27 = vmov (%p227_p5), %v538_v5 }
 0x4c0   :  { %210 = sbr.rel (!%p207_p6) target bundleno = 302 (0x12e), region = 123  ;;  %v1485_v24 = vmov (%p207_p6), %v538_v5  ;;  %v1486_v25 = vmov (%p207_p6), %v540_v4  ;;  %v1487_v26 = vmov (%p207_p6), %v539_v3 }
 0x4c5 PF:  { %544 = vst [vmem:[#allocation14] sm:$0x1] %v1085_v24  ;;  %s554_s7 = sshll.u32 %s1470_s13, 4  ;;  %s1105_s6 = smov [#allocation14]   ;;  %v1093_v26 = vphi %v1473_v26, %v1487_v26   ;;  %v1089_v25 = vphi %v1472_v25, %v1486_v25   ;;  %v1085_v24 = vphi %v1243_v24, %v1485_v24   ;;  %s555_s7 = int_to_ptr.hbm [resolvable:$true] %s554_s7 }
 0x4c6   :  { %545 = vst [vmem:[#allocation15] sm:$0x1] %v1093_v26  ;;  %s552_s8 = sshll.u32 %s1105_s6, 4  ;;  %s1106_s9 = smov [#allocation15]   ;;  %s553_s8 = int_to_ptr.vmem [resolvable:$true] %s552_s8 }
 0x4c7   :  { %546 = vst [vmem:[#allocation15 + $0x1] sm:$0x1] %v1089_v25  ;;  %557 = dma.vmem_to_hbm [thread:$0]  %s553_s8, 16, %s555_s7, [#allocation7]  }
 0x4c8   :  { %s563_s10 = sshll.u32 %s1106_s9, 4  ;;  %s565_s16 = sshll.u32 %s1471_s14, 4  ;;  %s564_s10 = int_to_ptr.vmem [resolvable:$true] %s563_s10  ;;  %s566_s16 = int_to_ptr.hbm [resolvable:$true] %s565_s16 }
 0x4c9   :  { %568 = dma.vmem_to_hbm [thread:$0]  %s564_s10, 32, %s566_s16, [#allocation16]  }
 0x4ca   :  { %1031 = dma.done.wait [#allocation7], 16  }
 0x4cb   :  { %1032 = vsyncadd [#allocation7], 4294967280 }
 0x4cc   :  { %1033 = dma.done.wait [#allocation16], 32  }
 0x4cd   :  { %1034 = vsyncadd [#allocation16], 4294967264 }
 0x4ce   :  { %577 = vsyncpa [#allocation6], 1 }
 0x4cf   :  { %578 = vsyncpa [#allocation9], 1 }
 0x4d0   :  { %579 = vsyncpa [#allocation12], 1 }
 0x4d1   :  { %580 = vsyncpa [#allocation7], 1 }
 0x4d2   :  { %581 = vsyncpa [#allocation16], 1 }

</bundles_post_ra>
